<compile_context>
chip_gen: v5e
topology: v5e:2x2
jax: 0.10.0
libtpu: 0.0.40
codegen_flags: <defaults>
</compile_context>

<pallas_src>
import functools
import math

import jax
import jax.numpy as jnp
from jax import lax
from jax.experimental import pallas as pl
from jax.experimental.pallas import tpu as pltpu

# MXU operand dtype. bf16 runs the v5e/v6e/v7x MXU at native peak; accumulation
# stays f32. Set to jnp.float32 for bit-level parity with the torch reference.
MXU_DTYPE = jnp.bfloat16
LN_EPS = 1e-6


# --------------------- generation-aware VMEM / tiling policy ------------------
def _vmem_capacity_bytes():
    try:
        info = pltpu.get_tpu_info()
        cap = getattr(info, "vmem_capacity_bytes", None)
        if cap:
            return int(cap)
    except Exception:
        pass
    return 64 * 1024 * 1024  # conservative fallback: assume v7x-sized VMEM


_VMEM_CAP = _vmem_capacity_bytes()
if _VMEM_CAP >= 128 * 1024 * 1024:      # v5e / v6e: 128 MiB physical VMEM
    _VMEM_LIMIT = 96 * 1024 * 1024
    _ROW_CAP = 512                      # ~85% of HBM roofline for mem-bound tiles
    _FF_CAP = 1024
else:                                   # v7x: 64 MiB per TensorCore
    _VMEM_LIMIT = 48 * 1024 * 1024
    _ROW_CAP = 256
    _FF_CAP = 512


def _cparams(semantics):
    return pltpu.CompilerParams(
        dimension_semantics=semantics,
        vmem_limit_bytes=_VMEM_LIMIT,
    )


def _row_tile(m):
    return m if m <= _ROW_CAP else _ROW_CAP


def _ff_tile(dff):
    if dff <= _FF_CAP:
        return dff
    for t in (1024, 512, 256, 128):
        if t <= _FF_CAP and dff % t == 0:
            return t
    return dff  # fallback: no hidden-dim tiling


def _q_tile(sq, cap=256):
    if sq <= cap:
        return sq
    for t in range(cap, 7, -8):          # largest multiple-of-8 divisor <= cap
        if sq % t == 0:
            return t
    return sq


def _layernorm_rows(x, alpha, bias):
    # Matches the custom torch LayerNormalization: scalar alpha/bias,
    # unbiased std (divide by D-1), eps added to std (not variance).
    d = x.shape[-1]
    mean = jnp.mean(x, axis=-1, keepdims=True)
    xc = x - mean
    var = jnp.sum(xc * xc, axis=-1, keepdims=True) / jnp.float32(d - 1)
    std = jnp.sqrt(var)
    return alpha * xc / (std + LN_EPS) + bias


# ------------------------- LN + fused QKV projection -------------------------
def _ln_qkv_kernel(x_ref, ab_ref, w_ref, b_ref, q_ref, k_ref, v_ref, *, d_model):
    x = x_ref[...].astype(jnp.float32)
    xn = _layernorm_rows(x, ab_ref[0], ab_ref[1])
    acc = jnp.dot(xn.astype(MXU_DTYPE), w_ref[...].astype(MXU_DTYPE),
                  preferred_element_type=jnp.float32) + b_ref[...]
    q_ref[...] = acc[:, :d_model].astype(q_ref.dtype)
    k_ref[...] = acc[:, d_model:2 * d_model].astype(k_ref.dtype)
    v_ref[...] = acc[:, 2 * d_model:].astype(v_ref.dtype)


def ln_qkv_proj(x, alpha, bias, wqkv, bqkv):
    B, S, D = x.shape
    M = B * S
    d3 = wqkv.shape[1]
    d_model = d3 // 3
    tm = _row_tile(M)
    ab = jnp.stack([alpha, bias]).astype(jnp.float32)
    q, k, v = pl.pallas_call(
        functools.partial(_ln_qkv_kernel, d_model=d_model),
        out_shape=(jax.ShapeDtypeStruct((M, d_model), MXU_DTYPE),) * 3,
        grid=(pl.cdiv(M, tm),),
        in_specs=[
            pl.BlockSpec((tm, D), lambda i: (i, 0)),
            pl.BlockSpec(memory_space=pltpu.MemorySpace.SMEM),
            pl.BlockSpec((D, d3), lambda i: (0, 0)),
            pl.BlockSpec((1, d3), lambda i: (0, 0)),
        ],
        out_specs=(pl.BlockSpec((tm, d_model), lambda i: (i, 0)),) * 3,
        compiler_params=_cparams(("parallel",)),
    )(x.reshape(M, D), ab, wqkv.astype(MXU_DTYPE),
      bqkv.reshape(1, d3).astype(jnp.float32))
    return (q.reshape(B, S, d_model), k.reshape(B, S, d_model),
            v.reshape(B, S, d_model))


# --------------------------- LN + single projection --------------------------
def _ln_proj_kernel(x_ref, ab_ref, w_ref, b_ref, o_ref):
    x = x_ref[...].astype(jnp.float32)
    xn = _layernorm_rows(x, ab_ref[0], ab_ref[1])
    acc = jnp.dot(xn.astype(MXU_DTYPE), w_ref[...].astype(MXU_DTYPE),
                  preferred_element_type=jnp.float32) + b_ref[...]
    o_ref[...] = acc.astype(o_ref.dtype)


def ln_proj(x, alpha, bias, w, b, out_dtype=None):
    B, S, D = x.shape
    M = B * S
    dout = w.shape[1]
    tm = _row_tile(M)
    out_dtype = x.dtype if out_dtype is None else out_dtype
    ab = jnp.stack([alpha, bias]).astype(jnp.float32)
    out = pl.pallas_call(
        _ln_proj_kernel,
        out_shape=jax.ShapeDtypeStruct((M, dout), out_dtype),
        grid=(pl.cdiv(M, tm),),
        in_specs=[
            pl.BlockSpec((tm, D), lambda i: (i, 0)),
            pl.BlockSpec(memory_space=pltpu.MemorySpace.SMEM),
            pl.BlockSpec((D, dout), lambda i: (0, 0)),
            pl.BlockSpec((1, dout), lambda i: (0, 0)),
        ],
        out_specs=pl.BlockSpec((tm, dout), lambda i: (i, 0)),
        compiler_params=_cparams(("parallel",)),
    )(x.reshape(M, D), ab, w.astype(MXU_DTYPE),
      b.reshape(1, dout).astype(jnp.float32))
    return out.reshape(B, S, dout)


# --------------------- fused KV projection (encoder output) ------------------
def _kv_proj_kernel(x_ref, w_ref, b_ref, k_ref, v_ref, *, d_model):
    acc = jnp.dot(x_ref[...].astype(MXU_DTYPE), w_ref[...].astype(MXU_DTYPE),
                  preferred_element_type=jnp.float32) + b_ref[...]
    k_ref[...] = acc[:, :d_model].astype(k_ref.dtype)
    v_ref[...] = acc[:, d_model:].astype(v_ref.dtype)


def kv_proj(x, wkv, bkv):
    B, S, D = x.shape
    M = B * S
    d2 = wkv.shape[1]
    d_model = d2 // 2
    tm = _row_tile(M)
    k, v = pl.pallas_call(
        functools.partial(_kv_proj_kernel, d_model=d_model),
        out_shape=(jax.ShapeDtypeStruct((M, d_model), MXU_DTYPE),) * 2,
        grid=(pl.cdiv(M, tm),),
        in_specs=[
            pl.BlockSpec((tm, D), lambda i: (i, 0)),
            pl.BlockSpec((D, d2), lambda i: (0, 0)),
            pl.BlockSpec((1, d2), lambda i: (0, 0)),
        ],
        out_specs=(pl.BlockSpec((tm, d_model), lambda i: (i, 0)),) * 2,
        compiler_params=_cparams(("parallel",)),
    )(x.reshape(M, D), wkv.astype(MXU_DTYPE),
      bkv.reshape(1, d2).astype(jnp.float32))
    return k.reshape(B, S, d_model), v.reshape(B, S, d_model)


# ------------- attention (all heads, per (batch, q-tile)) + out-proj ----------
def _attn_out_res_kernel(q_ref, k_ref, v_ref, mb_ref, wo_ref, bo_ref, xres_ref,
                         o_ref, ctx_ref, *, h):
    D = q_ref.shape[-1]
    dk = D // h
    scale = jnp.float32(1.0 / math.sqrt(dk))
    mbias = mb_ref[...]  # (1|tq, Skv) additive bias: 0 keep / -1e9 drop

    # TODO(synk): with dk < 128 the per-head matmuls underfill the 256-deep MXU
    # and the lane slices cross (8,128) tiles; a head-major / 128-padded QKV
    # layout would remove those relayouts (model-config-level change).
    for hh in range(h):  # static unroll over heads; per-head softmax
        lo, hi = hh * dk, (hh + 1) * dk
        qh = q_ref[:, lo:hi].astype(MXU_DTYPE)
        kh = k_ref[:, lo:hi].astype(MXU_DTYPE)
        vh = v_ref[:, lo:hi].astype(MXU_DTYPE)
        # q @ k^T without materializing a transpose (contract last dims).
        s = lax.dot_general(qh, kh, (((1,), (1,)), ((), ())),
                            preferred_element_type=jnp.float32)
        s = s * scale + mbias
        s = s - jnp.max(s, axis=-1, keepdims=True)
        p = jnp.exp(s)
        p = p * pl.reciprocal(jnp.sum(p, axis=-1, keepdims=True), approx=True)
        ctx_ref[:, lo:hi] = lax.dot_general(
            p.astype(MXU_DTYPE), vh, (((1,), (0,)), ((), ())),
            preferred_element_type=jnp.float32)

    out = jnp.dot(ctx_ref[...].astype(MXU_DTYPE), wo_ref[...].astype(MXU_DTYPE),
                  preferred_element_type=jnp.float32) + bo_ref[...]
    o_ref[...] = (xres_ref[...].astype(jnp.float32) + out).astype(o_ref.dtype)


def attention_out_residual(q, k, v, mask, wo, bo, x_res, h):
    B, Sq, D = q.shape
    Skv = k.shape[1]
    if mask.ndim == 4:
        # torch broadcasts a singleton head dim; drop it.
        # TODO(synk): a genuinely per-head mask (values differing across heads)
        # is not supported — only head 0 would be used.
        mask3 = mask[:, 0]
    elif mask.ndim == 3:
        mask3 = mask
    else:
        raise ValueError("mask must be 3-D or 4-D")
    # Additive bias precomputed in the wrapper: one VPU add in-kernel instead
    # of a compare+select per score element.
    mbias = jnp.where(mask3 == 0, jnp.float32(-1e9), jnp.float32(0.0))
    mq = mbias.shape[1]

    tq = _q_tile(Sq)
    nq = Sq // tq
    if mq == Sq:
        mblk, m_map = tq, (lambda b, qi: (b, qi, 0))
    else:
        mblk, m_map = 1, (lambda b, qi: (b, 0, 0))

    return pl.pallas_call(
        functools.partial(_attn_out_res_kernel, h=h),
        out_shape=jax.ShapeDtypeStruct((B, Sq, D), x_res.dtype),
        grid=(B, nq),
        in_specs=[
            pl.BlockSpec((None, tq, D), lambda b, qi: (b, qi, 0)),
            pl.BlockSpec((None, Skv, D), lambda b, qi: (b, 0, 0)),
            pl.BlockSpec((None, Skv, D), lambda b, qi: (b, 0, 0)),
            pl.BlockSpec((None, mblk, Skv), m_map),
            pl.BlockSpec((D, D), lambda b, qi: (0, 0)),
            pl.BlockSpec((1, D), lambda b, qi: (0, 0)),
            pl.BlockSpec((None, tq, D), lambda b, qi: (b, qi, 0)),
        ],
        out_specs=pl.BlockSpec((None, tq, D), lambda b, qi: (b, qi, 0)),
        scratch_shapes=[pltpu.VMEM((tq, D), jnp.float32)],
        compiler_params=_cparams(("parallel", "parallel")),
    )(q, k, v, mbias, wo.astype(MXU_DTYPE),
      bo.reshape(1, D).astype(jnp.float32), x_res)


# -------------------- LN + FFN (Dff-tiled) + residual (fused) -----------------
def _ln_ffn_res_kernel(x_ref, ab_ref, w1_ref, b1_ref, w2_ref, b2_ref, o_ref,
                       xn_ref, acc_ref):
    j = pl.program_id(1)

    @pl.when(j == 0)
    def _():
        x = x_ref[...].astype(jnp.float32)
        xn_ref[...] = _layernorm_rows(x, ab_ref[0], ab_ref[1]).astype(xn_ref.dtype)
        acc_ref[...] = jnp.zeros_like(acc_ref)

    hid = jnp.dot(xn_ref[...].astype(MXU_DTYPE), w1_ref[...].astype(MXU_DTYPE),
                  preferred_element_type=jnp.float32) + b1_ref[...]
    hid = jnp.maximum(hid, 0.0)  # ReLU; dropout = identity (eval mode / p=0)
    acc_ref[...] += jnp.dot(hid.astype(MXU_DTYPE), w2_ref[...].astype(MXU_DTYPE),
                            preferred_element_type=jnp.float32)

    @pl.when(j == pl.num_programs(1) - 1)
    def _():
        out = acc_ref[...] + b2_ref[...] + x_ref[...].astype(jnp.float32)
        o_ref[...] = out.astype(o_ref.dtype)


def ln_ffn_residual(x, alpha, bias, w1, b1, w2, b2):
    B, S, D = x.shape
    M = B * S
    Dff = w1.shape[1]
    tm = _row_tile(M)
    tf = _ff_tile(Dff)
    nj = Dff // tf
    ab = jnp.stack([alpha, bias]).astype(jnp.float32)
    out = pl.pallas_call(
        _ln_ffn_res_kernel,
        out_shape=jax.ShapeDtypeStruct((M, D), x.dtype),
        grid=(pl.cdiv(M, tm), nj),
        in_specs=[
            pl.BlockSpec((tm, D), lambda i, j: (i, 0)),
            pl.BlockSpec(memory_space=pltpu.MemorySpace.SMEM),
            pl.BlockSpec((D, tf), lambda i, j: (0, j)),
            pl.BlockSpec((1, tf), lambda i, j: (0, j)),
            pl.BlockSpec((tf, D), lambda i, j: (j, 0)),
            pl.BlockSpec((1, D), lambda i, j: (0, 0)),
        ],
        out_specs=pl.BlockSpec((tm, D), lambda i, j: (i, 0)),
        scratch_shapes=[pltpu.VMEM((tm, D), MXU_DTYPE),
                        pltpu.VMEM((tm, D), jnp.float32)],
        compiler_params=_cparams(("parallel", "arbitrary")),
    )(x.reshape(M, D), ab, w1.astype(MXU_DTYPE),
      b1.reshape(1, Dff).astype(jnp.float32), w2.astype(MXU_DTYPE),
      b2.reshape(1, D).astype(jnp.float32))
    return out.reshape(B, S, D)


# ------------------------------- decoder block --------------------------------
# TODO(synk): dropout layers are identity here (p=0 / eval mode); stateful
# dropout on attention probabilities is not reproduced.
def decoder_block(x, enc_out, src_mask, tgt_mask, params):
    h = params["h"]
    msa, mca, ffn = params["msa"], params["mca"], params["ffn"]

    # Sublayer 0: x + SelfAttn(LN(x), LN(x), LN(x), tgt_mask)
    q, k, v = ln_qkv_proj(x, params["ln0_alpha"], params["ln0_bias"],
                          msa["wqkv"], msa["bqkv"])
    x = attention_out_residual(q, k, v, tgt_mask, msa["wo"], msa["bo"], x, h)

    # Sublayer 1: x + CrossAttn(LN(x), enc_out, enc_out, src_mask)
    q = ln_proj(x, params["ln1_alpha"], params["ln1_bias"], mca["wq"],
                mca["bq"], out_dtype=MXU_DTYPE)
    k, v = kv_proj(enc_out, mca["wkv"], mca["bkv"])
    x = attention_out_residual(q, k, v, src_mask, mca["wo"], mca["bo"], x, h)

    # Sublayer 2: x + FFN(LN(x))
    x = ln_ffn_residual(x, params["ln2_alpha"], params["ln2_bias"],
                        ffn["w1"], ffn["b1"], ffn["w2"], ffn["b2"])
    return x


# -------------------------------- param helpers --------------------------------
def _init_linear(key, d_in, d_out):
    kw, kb = jax.random.split(key)
    lim = 1.0 / math.sqrt(d_in)
    w = jax.random.uniform(kw, (d_in, d_out), jnp.float32, -lim, lim)
    b = jax.random.uniform(kb, (d_out,), jnp.float32, -lim, lim)
    return w, b


def init_decoder_params(key, d_model, d_ff, h):
    ks = jax.random.split(key, 10)
    wdt = MXU_DTYPE  # weights stored/streamed in MXU dtype (bf16 by default)
    # self-attention: fused [Wq|Wk|Wv] of shape (D, 3D)
    wq, bq = _init_linear(ks[0], d_model, d_model)
    wk, bk = _init_linear(ks[1], d_model, d_model)
    wv, bv = _init_linear(ks[2], d_model, d_model)
    wo, bo = _init_linear(ks[3], d_model, d_model)
    msa = dict(wqkv=jnp.concatenate([wq, wk, wv], axis=1).astype(wdt),
               bqkv=jnp.concatenate([bq, bk, bv]), wo=wo.astype(wdt), bo=bo)
    # cross-attention: separate Wq, fused [Wk|Wv] for the encoder output
    wq2, bq2 = _init_linear(ks[4], d_model, d_model)
    wk2, bk2 = _init_linear(ks[5], d_model, d_model)
    wv2, bv2 = _init_linear(ks[6], d_model, d_model)
    wo2, bo2 = _init_linear(ks[7], d_model, d_model)
    mca = dict(wq=wq2.astype(wdt), bq=bq2,
               wkv=jnp.concatenate([wk2, wv2], axis=1).astype(wdt),
               bkv=jnp.concatenate([bk2, bv2]), wo=wo2.astype(wdt), bo=bo2)
    w1, b1 = _init_linear(ks[8], d_model, d_ff)
    w2, b2 = _init_linear(ks[9], d_ff, d_model)
    return dict(
        h=h, msa=msa, mca=mca,
        ffn=dict(w1=w1.astype(wdt), b1=b1, w2=w2.astype(wdt), b2=b2),
        ln0_alpha=jnp.float32(1.0), ln0_bias=jnp.float32(0.0),
        ln1_alpha=jnp.float32(1.0), ln1_bias=jnp.float32(0.0),
        ln2_alpha=jnp.float32(1.0), ln2_bias=jnp.float32(0.0),
    )


if __name__ == "__main__":
    B, S_TGT, S_SRC, D, H, D_FF = 2, 8, 8, 32, 4, 64

    key = jax.random.PRNGKey(0)
    k_x, k_enc, k_par = jax.random.split(key, 3)

    x = jax.random.normal(k_x, (B, S_TGT, D), jnp.float32)
    enc_out = jax.random.normal(k_enc, (B, S_SRC, D), jnp.float32)
    tgt_mask = jnp.broadcast_to(
        jnp.tril(jnp.ones((S_TGT, S_TGT), jnp.float32))[None, None],
        (B, 1, S_TGT, S_TGT))
    src_mask = jnp.ones((B, 1, 1, S_SRC), jnp.float32)

    params = init_decoder_params(k_par, D, D_FF, H)

    out = decoder_block(x, enc_out, src_mask, tgt_mask, params)
    out = jax.block_until_ready(out)
    assert out.shape == (B, S_TGT, D) and out.dtype == jnp.float32
    assert bool(jnp.all(jnp.isfinite(out)))
    print("KERNEL_OK")
</pallas_src>

<mosaic_0001>
module attributes {stable_mosaic.version = 11 : i64} {
  func.func @_ln_qkv_kernel(%arg0: i32, %arg1: memref<16x32xf32, #tpu.memory_space<vmem>>, %arg2: memref<2xf32, #tpu.memory_space<smem>>, %arg3: memref<32x96xbf16, #tpu.memory_space<vmem>>, %arg4: memref<1x96xf32, #tpu.memory_space<vmem>>, %arg5: memref<16x32xbf16, #tpu.memory_space<vmem>>, %arg6: memref<16x32xbf16, #tpu.memory_space<vmem>>, %arg7: memref<16x32xbf16, #tpu.memory_space<vmem>>) attributes {dimension_semantics = [#tpu.dimension_semantics<parallel>], iteration_bounds = array<i64: 1>, scalar_prefetch = 0 : i64, scratch_operands = 0 : i64, tpu.core_type = #tpu.core_type<tc>, window_params = [{transform_indices = @transform_0, window_bounds = array<i64: 16, 32>}, {transform_indices = @transform_1, window_bounds = array<i64: 2>}, {pipeline_mode = #tpu.pipeline_mode<synchronous>, transform_indices = @transform_2, window_bounds = array<i64: 32, 96>}, {pipeline_mode = #tpu.pipeline_mode<synchronous>, transform_indices = @transform_3, window_bounds = array<i64: 1, 96>}, {transform_indices = @transform_4, window_bounds = array<i64: 16, 32>}, {transform_indices = @transform_5, window_bounds = array<i64: 16, 32>}, {transform_indices = @transform_6, window_bounds = array<i64: 16, 32>}]} {
    %c0 = arith.constant 0 : index
    %c0_0 = arith.constant 0 : index
    %0 = vector.load %arg1[%c0, %c0_0] : memref<16x32xf32, #tpu.memory_space<vmem>>, vector<16x32xf32>
    %c0_1 = arith.constant 0 : index
    %1 = memref.load %arg2[%c0_1] : memref<2xf32, #tpu.memory_space<smem>>
    %c1 = arith.constant 1 : index
    %2 = memref.load %arg2[%c1] : memref<2xf32, #tpu.memory_space<smem>>
    %cst = arith.constant dense<0.000000e+00> : vector<16xf32>
    %3 = vector.multi_reduction <add>, %0, %cst [1] : vector<16x32xf32> to vector<16xf32>
    %4 = vector.shape_cast %3 : vector<16xf32> to vector<16x1xf32>
    %cst_2 = arith.constant 3.200000e+01 : f32
    %5 = vector.broadcast %cst_2 : f32 to vector<16x1xf32>
    %6 = arith.divf %4, %5 : vector<16x1xf32>
    %7 = vector.broadcast %6 : vector<16x1xf32> to vector<16x32xf32>
    %8 = arith.subf %0, %7 : vector<16x32xf32>
    %9 = arith.mulf %8, %8 : vector<16x32xf32>
    %cst_3 = arith.constant dense<0.000000e+00> : vector<16xf32>
    %10 = vector.multi_reduction <add>, %9, %cst_3 [1] : vector<16x32xf32> to vector<16xf32>
    %11 = vector.shape_cast %10 : vector<16xf32> to vector<16x1xf32>
    %cst_4 = arith.constant 3.100000e+01 : f32
    %12 = vector.broadcast %cst_4 : f32 to vector<16x1xf32>
    %13 = arith.divf %11, %12 : vector<16x1xf32>
    %14 = math.sqrt %13 : vector<16x1xf32>
    %15 = vector.broadcast %1 : f32 to vector<16x32xf32>
    %16 = arith.mulf %15, %8 : vector<16x32xf32>
    %cst_5 = arith.constant 9.99999997E-7 : f32
    %17 = vector.broadcast %cst_5 : f32 to vector<16x1xf32>
    %18 = arith.addf %14, %17 : vector<16x1xf32>
    %19 = vector.broadcast %18 : vector<16x1xf32> to vector<16x32xf32>
    %20 = arith.divf %16, %19 : vector<16x32xf32>
    %21 = vector.broadcast %2 : f32 to vector<16x32xf32>
    %22 = arith.addf %20, %21 : vector<16x32xf32>
    %23 = arith.truncf %22 : vector<16x32xf32> to vector<16x32xbf16>
    %c0_6 = arith.constant 0 : index
    %c0_7 = arith.constant 0 : index
    %24 = vector.load %arg3[%c0_6, %c0_7] : memref<32x96xbf16, #tpu.memory_space<vmem>>, vector<32x96xbf16>
    %cst_8 = arith.constant dense<0.000000e+00> : vector<16x96xf32>
    %25 = tpu.matmul %23, %24, %cst_8 {dimension_numbers = #tpu.dot_dimension_numbers<[1], [0], [0], [1], [0, 0, 1, 1], [], []>} : vector<16x32xbf16>, vector<32x96xbf16>, vector<16x96xf32> -> vector<16x96xf32>
    %c0_9 = arith.constant 0 : index
    %c0_10 = arith.constant 0 : index
    %26 = vector.load %arg4[%c0_9, %c0_10] : memref<1x96xf32, #tpu.memory_space<vmem>>, vector<1x96xf32>
    %27 = vector.broadcast %26 : vector<1x96xf32> to vector<16x96xf32>
    %28 = arith.addf %25, %27 : vector<16x96xf32>
    %29 = vector.extract_strided_slice %28 {offsets = [0, 0], sizes = [16, 32], strides = [1, 1]} : vector<16x96xf32> to vector<16x32xf32>
    %30 = arith.truncf %29 : vector<16x32xf32> to vector<16x32xbf16>
    %c0_11 = arith.constant 0 : index
    %c0_12 = arith.constant 0 : index
    %31 = vector.load %arg5[%c0_11, %c0_12] : memref<16x32xbf16, #tpu.memory_space<vmem>>, vector<16x32xbf16>
    tpu.vector_store %arg5[%c0_11, %c0_12], %30 {strides = array<i32>} : memref<16x32xbf16, #tpu.memory_space<vmem>>, vector<16x32xbf16>,
    %32 = vector.extract_strided_slice %28 {offsets = [0, 32], sizes = [16, 32], strides = [1, 1]} : vector<16x96xf32> to vector<16x32xf32>
    %33 = arith.truncf %32 : vector<16x32xf32> to vector<16x32xbf16>
    %c0_13 = arith.constant 0 : index
    %c0_14 = arith.constant 0 : index
    %34 = vector.load %arg6[%c0_13, %c0_14] : memref<16x32xbf16, #tpu.memory_space<vmem>>, vector<16x32xbf16>
    tpu.vector_store %arg6[%c0_13, %c0_14], %33 {strides = array<i32>} : memref<16x32xbf16, #tpu.memory_space<vmem>>, vector<16x32xbf16>,
    %35 = vector.extract_strided_slice %28 {offsets = [0, 64], sizes = [16, 32], strides = [1, 1]} : vector<16x96xf32> to vector<16x32xf32>
    %36 = arith.truncf %35 : vector<16x32xf32> to vector<16x32xbf16>
    %c0_15 = arith.constant 0 : index
    %c0_16 = arith.constant 0 : index
    %37 = vector.load %arg7[%c0_15, %c0_16] : memref<16x32xbf16, #tpu.memory_space<vmem>>, vector<16x32xbf16>
    tpu.vector_store %arg7[%c0_15, %c0_16], %36 {strides = array<i32>} : memref<16x32xbf16, #tpu.memory_space<vmem>>, vector<16x32xbf16>,
    return
  }
  func.func @transform_0(%arg0: i32) -> (i32, i32) {
    %c0_i32 = arith.constant 0 : i32
    %c0_i32_0 = arith.constant 0 : i32
    return %arg0, %c0_i32 : i32, i32
  }
  func.func @transform_1(%arg0: i32) -> i32 {
    %c0_i32 = arith.constant 0 : i32
    %c0_i32_0 = arith.constant 0 : i32
    return %c0_i32 : i32
  }
  func.func @transform_2(%arg0: i32) -> (i32, i32) {
    %c0_i32 = arith.constant 0 : i32
    %c0_i32_0 = arith.constant 0 : i32
    %c0_i32_1 = arith.constant 0 : i32
    return %c0_i32, %c0_i32_0 : i32, i32
  }
  func.func @transform_3(%arg0: i32) -> (i32, i32) {
    %c0_i32 = arith.constant 0 : i32
    %c0_i32_0 = arith.constant 0 : i32
    %c0_i32_1 = arith.constant 0 : i32
    return %c0_i32, %c0_i32_0 : i32, i32
  }
  func.func @transform_4(%arg0: i32) -> (i32, i32) {
    %c0_i32 = arith.constant 0 : i32
    %c0_i32_0 = arith.constant 0 : i32
    return %arg0, %c0_i32 : i32, i32
  }
  func.func @transform_5(%arg0: i32) -> (i32, i32) {
    %c0_i32 = arith.constant 0 : i32
    %c0_i32_0 = arith.constant 0 : i32
    return %arg0, %c0_i32 : i32, i32
  }
  func.func @transform_6(%arg0: i32) -> (i32, i32) {
    %c0_i32 = arith.constant 0 : i32
    %c0_i32_0 = arith.constant 0 : i32
    return %arg0, %c0_i32 : i32, i32
  }
}

</mosaic_0001>

<bundles_post_ra>
// kernel: tpu_custom_call.1
= control target key start
LH: loop header
LB: loop body
LE: loop exit
PB: predicated region body
PF: predicated region fallthrough
CT: control target
= control target key end

     0   :  { %12 = vsyncpa [#allocation3], 0  ;;  %s570_s0 = inlined_call_operand.hbm [shape: f32[16,32], index: 0, kind: input, shape index: {}]   ;;  %s571_s1 = inlined_call_operand.hbm [shape: f32[2], index: 1, kind: input, shape index: {}]   ;;  %s572_s2 = inlined_call_operand.hbm [shape: bf16[32,96], index: 2, kind: input, shape index: {}]   ;;  %s573_s3 = inlined_call_operand.vmem [shape: f32[1,96], index: 3, kind: input, shape index: {}]   ;;  %s574_s4 = inlined_call_operand.hbm [shape: bf16[16,32], index: 4, kind: output, shape index: {0}]   ;;  %s575_s5 = inlined_call_operand.hbm [shape: bf16[16,32], index: 5, kind: output, shape index: {1}]   ;;  %s576_s6 = inlined_call_operand.hbm [shape: bf16[16,32], index: 6, kind: output, shape index: {2}]  }
   0x1   :  { %13 = vsyncpa [#allocation5], 0 }
   0x2   :  { %14 = vsyncpa [#allocation8], 0 }
   0x3   :  { %15 = vsyncpa [#allocation4], 0 }
   0x4   :  { %16 = vsyncpa [#allocation11], 0  ;;  %s21_s23 = sshll.u32 %s570_s0, 4  ;;  %s466_s24 = smov [#allocation2]   ;;  %s22_s23 = int_to_ptr.hbm [resolvable:$true] %s21_s23 }
   0x5   :  { %s23_s25 = sshll.u32 %s466_s24, 4  ;;  %s35_s28 = sshll.u32 %s571_s1, 4  ;;  %s24_s25 = int_to_ptr.vmem [resolvable:$true] %s23_s25  ;;  %s36_s28 = int_to_ptr.hbm [resolvable:$true] %s35_s28 }
   0x6   :  { %s467_s29 = smov 128   ;;  %s468_s30 = smov 8  }
   0x7   :  { %29 = dma.hbm_to_vmem [thread:$0]  %s22_s23, 256, %s24_s25, [#allocation3], %s467_s29, %s467_s29, %s468_s30  }
   0x8   :  { %s469_s7 = smov [#allocation6]   ;;  %s43_s10 = sshll.u32 %s572_s2, 4  ;;  %s44_s10 = int_to_ptr.hbm [resolvable:$true] %s43_s10 }
   0x9   :  { %38 = dma.hbm_to_smem %s36_s28, 16, %s469_s7, [#allocation5]  }
   0xa   :  { %s470_s0 = smov [#allocation7]   ;;  %s471_s12 = smov 64  }
   0xb   :  { %s45_s11 = sshll.u32 %s470_s0, 4  ;;  %s472_s13 = smov 4   ;;  %s46_s11 = int_to_ptr.vmem [resolvable:$true] %s45_s11 }
   0xc   :  { %51 = dma.hbm_to_vmem [thread:$0]  %s44_s10, 256, %s46_s11, [#allocation8], %s471_s12, %s471_s12, %s472_s13  }
   0xd   :  { %456 = dma.done.wait [#allocation3], 256  }
   0xe   :  { %457 = vsyncadd [#allocation3], 4294967040 }
   0xf   :  { %458 = dma.done.wait [#allocation5], 16  }
  0x10   :  { %459 = vsyncadd [#allocation5], 4294967280 }
  0x11   :  { %460 = dma.done.wait [#allocation8], 256  }
  0x12   :  { %461 = vsyncadd [#allocation8], 4294967040 }
  0x13   :  { %66 = sfence }
  0x14   :  { %v68_v0 = vld [vmem:[#allocation2] sm:$0xff]  ;;  %vm72_vm0 = vcmask 261120   ;;  %v69_v2 = vld [vmem:[#allocation2 + $0x8] sm:$0xff]  ;;  %v473_v4 = vmov 32.0   ;;  %v474_v21 = vmov 31.0   ;;  %v297_v28 = vld [vmem:[#allocation7 + $0x8] sm:$0xff] }
  0x15   :  { %v73_v1 = vsel %vm72_vm0, %v68_v0, 0.0  ;;  %v76_v3 = vsel %vm72_vm0, %v69_v2, 0.0  ;;  %312 = vrcp.f32 %v473_v4  ;;  %199 = vmatpush.bf16.msra.mxu0 %v297_v28  ;;  %v296_v30 = vld [vmem:[#allocation7] sm:$0xff]  ;;  %s70_s1 = sld [smem:[#allocation6]]  ;;  %vm209_vm15 = vcmask 257024   ;;  %s475_s16 = smov 96  }
  0x16   :  { %74 = vadd.xlane.f32.xlu0 %v73_v1  ;;  %314 = vrcp.f32 %v474_v21  ;;  %s286_s2 = sld [smem:[#allocation6 + $0x1]]  ;;  %s476_s17 = smov [#allocation9]  }
  0x17   :  { %s234_s18 = sshll.u32 %s476_s17, 4  ;;  %s236_s21 = sshll.u32 %s574_s4, 4  ;;  %s235_s18 = int_to_ptr.vmem [resolvable:$true] %s234_s18  ;;  %s237_s21 = int_to_ptr.hbm [resolvable:$true] %s236_s21 }
  0x18   :  { %s249_s24 = sshll.u32 %s575_s5, 4  ;;  %s478_s25 = smov [#allocation12]   ;;  %s250_s24 = int_to_ptr.hbm [resolvable:$true] %s249_s24 }
  0x19   :  { %200 = vmatpush.bf16.msra.mxu0 %v296_v30  ;;  %s260_s26 = sshll.u32 %s478_s25, 4  ;;  %s262_s29 = sshll.u32 %s576_s6, 4  ;;  %s261_s26 = int_to_ptr.vmem [resolvable:$true] %s260_s26  ;;  %s263_s29 = int_to_ptr.hbm [resolvable:$true] %s262_s29 }
  0x1b   :  { %v313_v5 = vpop.eup %312 }
  0x1c   :  { %v80_v6 = vmul.f32 32.0, %v313_v5  ;;  %vm84_vm1 = vweird.f32 %v313_v5  ;;  %v315_v22 = vpop.eup %314 }
  0x1d   :  { %v99_v23 = vmul.f32 31.0, %v315_v22  ;;  %vm103_vm2 = vweird.f32 %v315_v22 }
  0x1e   :  { %77 = vadd.xlane.f32.xlu0 %v76_v3  ;;  %v81_v7 = vsub.f32 1.0, %v80_v6  ;;  %v131_v3 = vstv %s70_s1 }
  0x1f   :  { %v100_v24 = vsub.f32 1.0, %v99_v23 }
  0x20   :  { %v82_v8 = vmul.f32 %v313_v5, %v81_v7 }
  0x21   :  { %v101_v25 = vmul.f32 %v315_v22, %v100_v24 }
  0x22   :  { %v83_v9 = vadd.f32 %v313_v5, %v82_v8 }
  0x23   :  { %v102_v26 = vadd.f32 %v315_v22, %v101_v25 }
  0x24   :  { %v85_v10 = vsel %vm84_vm1, %v313_v5, %v83_v9 }
  0x25   :  { %v104_v27 = vsel %vm103_vm2, %v315_v22, %v102_v26 }
  0x89   :  { %v75_v11 = vpop.xlane.xlu0 %74 }
  0x8a   :  { %v86_v12 = vmul.f32 %v85_v10, %v75_v11 }
  0x8c   :  { %v528_v13 = vsub.f32 %v68_v0, %v86_v12 }
  0x8e   :  { %v90_v14 = vmul.f32 %v528_v13, %v528_v13  ;;  %v132_v9 = vmul.f32 %v131_v3, %v528_v13  ;;  %v311_v13 = vld [vmem:[%s573_s3] ss:$0 sm:$0xff]  ;;  %s477_s3 = smov [#allocation10]  }
  0x8f   :  { %s247_s22 = sshll.u32 %s477_s3, 4  ;;  %s248_s22 = int_to_ptr.vmem [resolvable:$true] %s247_s22 }
  0x90   :  { %v92_v15 = vsel %vm72_vm0, %v90_v14, 0.0 }
  0x91   :  { %93 = vadd.xlane.f32.xlu1 %v92_v15  ;;  %v78_v16 = vpop.xlane.xlu0 %77 }
  0x92   :  { %v87_v17 = vmul.f32 %v85_v10, %v78_v16 }
  0x94   :  { %v533_v18 = vsub.f32 %v69_v2, %v87_v17  ;;  %v166_v17 = vstv %s286_s2 }
  0x96   :  { %v91_v19 = vmul.f32 %v533_v18, %v533_v18  ;;  %v133_v12 = vmul.f32 %v131_v3, %v533_v18 }
  0x98   :  { %v95_v20 = vsel %vm72_vm0, %v91_v19, 0.0 }
  0x99   :  { %96 = vadd.xlane.f32.xlu1 %v95_v20 }
 0x104   :  { %v94_v29 = vpop.xlane.xlu1 %93 }
 0x105   :  { %v105_v31 = vmul.f32 %v104_v27, %v94_v29 }
 0x107   :  { %316 = vrsqrt.f32 %v105_v31  ;;  %vm114_vm3 = vcmp.eq.f32.partialorder %v105_v31, inf  ;;  %v117_v44 = vand.u32 2147483648, %v105_v31  ;;  %vm116_vm4 = vcmp.eq.f32.partialorder %v105_v31, 0.0 }
 0x10c   :  { %v97_v32 = vpop.xlane.xlu1 %96 }
 0x10d   :  { %v317_v33 = vpop.eup %316  ;;  %v106_v34 = vmul.f32 %v104_v27, %v97_v32 }
 0x10e   :  { %v108_v35 = vmul.f32 %v317_v33, %v105_v31 }
 0x10f   :  { %318 = vrsqrt.f32 %v106_v34  ;;  %vm126_vm5 = vcmp.eq.f32.partialorder %v106_v34, inf  ;;  %v129_v52 = vand.u32 2147483648, %v106_v34  ;;  %vm128_vm6 = vcmp.eq.f32.partialorder %v106_v34, 0.0 }
 0x110   :  { %v109_v36 = vmul.f32 %v317_v33, %v108_v35 }
 0x112   :  { %v110_v37 = vmul.f32 0.5, %v109_v36 }
 0x114   :  { %v111_v38 = vsub.f32 1.5, %v110_v37 }
 0x115   :  { %v319_v39 = vpop.eup %318 }
 0x116   :  { %v112_v40 = vmul.f32 %v317_v33, %v111_v38  ;;  %v120_v41 = vmul.f32 %v319_v39, %v106_v34 }
 0x118   :  { %v113_v42 = vmul.f32 %v112_v40, %v105_v31  ;;  %v121_v43 = vmul.f32 %v319_v39, %v120_v41 }
 0x11a   :  { %v115_v45 = vsel %vm114_vm3, %v105_v31, %v113_v42  ;;  %v122_v46 = vmul.f32 0.5, %v121_v43 }
 0x11b   :  { %v118_v47 = vsel %vm116_vm4, %v117_v44, %v115_v45 }
 0x11c   :  { %v123_v48 = vsub.f32 1.5, %v122_v46  ;;  %v134_v49 = vadd.f32 1e-06, %v118_v47 }
 0x11e   :  { %v124_v50 = vmul.f32 %v319_v39, %v123_v48  ;;  %320 = vrcp.f32 %v134_v49  ;;  %v147_v62 = vand.u32 2147483648, %v134_v49  ;;  %vm141_vm8 = vweird.f32 %v134_v49 }
 0x11f   :  { %v145_v63 = vand.u32 2147483647, %v134_v49 }
 0x120   :  { %v125_v51 = vmul.f32 %v124_v50, %v106_v34  ;;  %v148_v4 = vor.u32 1.1754944e-38, %v147_v62 }
 0x121   :  { %vm146_vm10 = vcmp.eq.f32.partialorder %v145_v63, 8.507059e+37 }
 0x122   :  { %v127_v53 = vsel %vm126_vm5, %v106_v34, %v125_v51 }
 0x123   :  { %v130_v54 = vsel %vm128_vm6, %v129_v52, %v127_v53 }
 0x124   :  { %v321_v55 = vpop.eup %320  ;;  %v135_v56 = vadd.f32 1e-06, %v130_v54 }
 0x125   :  { %v137_v57 = vmul.f32 %v321_v55, %v134_v49  ;;  %vm142_vm7 = vweird.f32 %v321_v55 }
 0x126   :  { %322 = vrcp.f32 %v135_v56  ;;  %vm143_vm9 = vmor %vm141_vm8, %vm142_vm7  ;;  %v162_v5 = vand.u32 2147483648, %v135_v56  ;;  %v160_v7 = vand.u32 2147483647, %v135_v56  ;;  %vm156_vm12 = vweird.f32 %v135_v56 }
 0x127   :  { %v138_v58 = vsub.f32 1.0, %v137_v57 }
 0x128   :  { %v163_v11 = vor.u32 1.1754944e-38, %v162_v5  ;;  %vm161_vm14 = vcmp.eq.f32.partialorder %v160_v7, 8.507059e+37 }
 0x129   :  { %v139_v59 = vmul.f32 %v321_v55, %v138_v58 }
 0x12b   :  { %v140_v60 = vadd.f32 %v321_v55, %v139_v59 }
 0x12c   :  { %v323_v61 = vpop.eup %322 }
 0x12d   :  { %v152_v0 = vmul.f32 %v323_v61, %v135_v56  ;;  %v144_v1 = vsel %vm143_vm9, %v321_v55, %v140_v60  ;;  %vm157_vm11 = vweird.f32 %v323_v61 }
 0x12e   :  { %v149_v8 = vsel %vm146_vm10, %v148_v4, %v144_v1  ;;  %vm158_vm13 = vmor %vm156_vm12, %vm157_vm11 }
 0x12f   :  { %v153_v2 = vsub.f32 1.0, %v152_v0  ;;  %v150_v14 = vmul.f32 %v149_v8, %v132_v9 }
 0x131   :  { %v154_v6 = vmul.f32 %v323_v61, %v153_v2  ;;  %v167_v20 = vadd.f32 %v166_v17, %v150_v14 }
 0x133   :  { %v155_v10 = vadd.f32 %v323_v61, %v154_v6 }
 0x135   :  { %v159_v15 = vsel %vm158_vm13, %v323_v61, %v155_v10 }
 0x136   :  { %v164_v16 = vsel %vm161_vm14, %v163_v11, %v159_v15 }
 0x137   :  { %v165_v19 = vmul.f32 %v164_v16, %v133_v12 }
 0x139   :  { %v168_v21 = vadd.f32 %v166_v17, %v165_v19 }
 0x13b   :  { %v169_v22 = vpack.c.bf16 %v168_v21, %v167_v20 }
 0x13d   :  { %295 = vmatmul.msk.bf16.vlgmr.msra.gmra.mxu0 %vm72_vm0, %v169_v22 }
 0x1ba   :  { %v202_v23 = vpop.f32.mrf.mxu0 }
 0x1bb   :  { %v203_v24 = vadd.f32 %v311_v13, %v202_v23 }
 0x1bd   :  { %v207_v25 = vpack.c.bf16 %v203_v24, %v203_v24 }
 0x1bf   :  { %222 = vrot.lane.b32.xlu0 %v207_v25, %s471_s12  ;;  %214 = vrot.lane.b32.xlu2 %v207_v25, %s475_s16  ;;  %210 = vst.msk [vmem:[#allocation9] sm:$0xf] %vm209_vm15, %v207_v25 }
 0x1c2   :  { %v204_v18 = vpop.f32.mrf.mxu0 }
 0x1c3   :  { %v205_v26 = vadd.f32 %v311_v13, %v204_v18 }
 0x1c5   :  { %v208_v27 = vpack.c.bf16 %v205_v26, %v205_v26 }
 0x1c7   :  { %224 = vrot.lane.b32.xlu1 %v208_v27, %s471_s12  ;;  %216 = vrot.lane.b32.xlu2 %v208_v27, %s475_s16  ;;  %211 = vst.msk [vmem:[#allocation9 + $0x4] sm:$0xf] %vm209_vm15, %v208_v27 }
 0x1c8   :  { %242 = dma.vmem_to_hbm [thread:$0]  %s235_s18, 128, %s237_s21, [#allocation4], %s471_s12, %s471_s12, %s472_s13  }
 0x219   :  { %v215_v28 = vpop.permute.xlu2 %214 }
 0x21a   :  { %220 = vst.msk [vmem:[#allocation10] sm:$0xf] %vm209_vm15, %v215_v28 }
 0x221   :  { %v217_v29 = vpop.permute.xlu2 %216 }
 0x222   :  { %221 = vst.msk [vmem:[#allocation10 + $0x4] sm:$0xf] %vm209_vm15, %v217_v29 }
 0x223   :  { %255 = dma.vmem_to_hbm [thread:$0]  %s248_s22, 128, %s250_s24, [#allocation11], %s471_s12, %s471_s12, %s472_s13  }
 0x231   :  { %v223_v30 = vpop.permute.xlu0 %222 }
 0x232   :  { %228 = vst.msk [vmem:[#allocation12] sm:$0xf] %vm209_vm15, %v223_v30 }
 0x239   :  { %v225_v31 = vpop.permute.xlu1 %224 }
 0x23a   :  { %229 = vst.msk [vmem:[#allocation12 + $0x4] sm:$0xf] %vm209_vm15, %v225_v31 }
 0x23b   :  { %268 = dma.vmem_to_hbm [thread:$0]  %s261_s26, 128, %s263_s29, [#allocation11], %s471_s12, %s471_s12, %s472_s13  }
 0x23c   :  { %462 = dma.done.wait [#allocation4], 128  }
 0x23d   :  { %463 = vsyncadd [#allocation4], 4294967168 }
 0x23e   :  { %464 = dma.done.wait [#allocation11], 256  }
 0x23f   :  { %465 = vsyncadd [#allocation11], 4294967040 }
 0x240   :  { %281 = vsyncpa [#allocation3], 1 }
 0x241   :  { %282 = vsyncpa [#allocation8], 1 }
 0x242   :  { %283 = vsyncpa [#allocation4], 1 }
 0x243   :  { %284 = vsyncpa [#allocation11], 1 }
 0x244   :  { %285 = vsyncpa [#allocation5], 1 }

</bundles_post_ra>
